<compile_context>
chip_gen: v6e
topology: v6e:2x2x1
jax: 0.10.0
libtpu: 0.0.40
codegen_flags: <defaults>
</compile_context>

<pallas_src>
import functools

import jax
import jax.numpy as jnp
from jax.experimental import pallas as pl
from jax.experimental.pallas import tpu as pltpu

H1, H2 = 60, 20            # logical hidden widths from the PyTorch module
H1_PAD, H2_PAD = 64, 32    # padded (vreg-friendly) hidden widths
LANE = 128                 # lane width for the output padding


def _round_up(x, m):
    return ((x + m - 1) // m) * m


def _ar_mlp_kernel(x_ref, w1_ref, b1_ref, w2_ref, b2_ref, w3_ref, b3_ref, o_ref):
    # bf16 operands into the MXU, f32 accumulation; biases / ReLU in f32.
    x = x_ref[...].astype(jnp.bfloat16)

    # fc_1 + ReLU
    h1 = jnp.dot(x, w1_ref[...], preferred_element_type=jnp.float32) + b1_ref[...]
    h1 = jnp.maximum(h1, 0.0).astype(jnp.bfloat16)

    # dropout(p=0.3) — identity in eval / inference mode.
    # TODO(synk): training-mode dropout would need pltpu.prng_seed + pltpu.stateful_bernoulli masking.

    # fc_2 + ReLU
    h2 = jnp.dot(h1, w2_ref[...], preferred_element_type=jnp.float32) + b2_ref[...]
    h2 = jnp.maximum(h2, 0.0).astype(jnp.bfloat16)

    # fc_3 (no activation), lane-dense 128-wide store (padded cols are exactly zero).
    o_ref[...] = (jnp.dot(h2, w3_ref[...], preferred_element_type=jnp.float32)
                  + b3_ref[...]).astype(o_ref.dtype)


def ar_mlp_forward(x, padded_params, num_classes, *, block_b=None,
                   out_dtype=jnp.bfloat16, slice_output=True):
    """x: (B, house_state_dim), f32 or bf16. padded_params: dict from pad_ar_mlp_params()."""
    B, D = x.shape
    c_pad = padded_params["w3"].shape[1]

    # Large, 8-aligned batch tile; grid iterates (and can shard across TCs) over it.
    if block_b is None:
        block_b = min(4096, _round_up(B, 8))
    assert block_b % 8 == 0, "block_b must be a multiple of 8 (sublane alignment)"

    # No explicit batch pad: the (single) edge tile's stores are masked by Pallas and its
    # garbage input rows are row-independent, so they are simply discarded.
    grid = (pl.cdiv(B, block_b),)

    x_bytes = jnp.dtype(x.dtype).itemsize
    w_bytes = jnp.dtype(padded_params["w1"].dtype).itemsize
    o_bytes = jnp.dtype(out_dtype).itemsize
    cost = pl.CostEstimate(
        flops=2 * B * (D * H1_PAD + H1_PAD * H2_PAD + H2_PAD * c_pad),
        transcendentals=0,
        bytes_accessed=(B * D * x_bytes + B * c_pad * o_bytes
                        + w_bytes * (D * H1_PAD + H1_PAD * H2_PAD + H2_PAD * c_pad)
                        + 4 * (H1_PAD + H2_PAD + c_pad)),
    )

    out = pl.pallas_call(
        _ar_mlp_kernel,
        out_shape=jax.ShapeDtypeStruct((B, c_pad), out_dtype),
        grid_spec=pl.GridSpec(
            grid=grid,
            in_specs=[
                pl.BlockSpec((block_b, D), lambda i: (i, 0)),       # x tile (streams over batch)
                pl.BlockSpec((D, H1_PAD), lambda i: (0, 0)),        # W1^T (bf16, resident)
                pl.BlockSpec((1, H1_PAD), lambda i: (0, 0)),        # b1 (f32)
                pl.BlockSpec((H1_PAD, H2_PAD), lambda i: (0, 0)),   # W2^T
                pl.BlockSpec((1, H2_PAD), lambda i: (0, 0)),        # b2
                pl.BlockSpec((H2_PAD, c_pad), lambda i: (0, 0)),    # W3^T (lane-padded to 128)
                pl.BlockSpec((1, c_pad), lambda i: (0, 0)),         # b3
            ],
            out_specs=pl.BlockSpec((block_b, c_pad), lambda i: (i, 0)),
        ),
        compiler_params=pltpu.CompilerParams(
            dimension_semantics=("parallel",),
        ),
        cost_estimate=cost,
    )(x, padded_params["w1"], padded_params["b1"],
      padded_params["w2"], padded_params["b2"],
      padded_params["w3"], padded_params["b3"])

    if slice_output:
        # Strip lane padding back to the logical class count (prefer fusing the consumer
        # of the logits into the kernel to skip this pass entirely).
        return out[:, :num_classes]
    return out


def init_ar_mlp_params(key, house_state_dim, num_classes):
    """PyTorch-Linear-style init (U[-1/sqrt(fan_in), 1/sqrt(fan_in)]), weights stored transposed."""
    def linear_init(k, fan_in, fan_out):
        kw, kb = jax.random.split(k)
        bound = 1.0 / jnp.sqrt(jnp.float32(fan_in))
        w = jax.random.uniform(kw, (fan_in, fan_out), jnp.float32, -bound, bound)
        b = jax.random.uniform(kb, (1, fan_out), jnp.float32, -bound, bound)
        return w, b

    k1, k2, k3 = jax.random.split(key, 3)
    w1, b1 = linear_init(k1, house_state_dim, H1)
    w2, b2 = linear_init(k2, H1, H2)
    w3, b3 = linear_init(k3, H2, num_classes)
    return {"w1": w1, "b1": b1, "w2": w2, "b2": b2, "w3": w3, "b3": b3}


def pad_ar_mlp_params(params):
    """Zero-pad to vreg-friendly widths and cast weights to bf16 (once, off the hot path)."""
    w1, b1 = params["w1"], params["b1"]
    w2, b2 = params["w2"], params["b2"]
    w3, b3 = params["w3"], params["b3"]
    c = w3.shape[1]
    c_pad = _round_up(max(c, 1), LANE)
    return {
        "w1": jnp.pad(w1, ((0, 0), (0, H1_PAD - H1))).astype(jnp.bfloat16),
        "b1": jnp.pad(b1, ((0, 0), (0, H1_PAD - H1))),
        "w2": jnp.pad(w2, ((0, H1_PAD - H1), (0, H2_PAD - H2))).astype(jnp.bfloat16),
        "b2": jnp.pad(b2, ((0, 0), (0, H2_PAD - H2))),
        "w3": jnp.pad(w3, ((0, H2_PAD - H2), (0, c_pad - c))).astype(jnp.bfloat16),
        "b3": jnp.pad(b3, ((0, 0), (0, c_pad - c))),
    }


def ar_mlp_reference(x, p):
    h1 = jnp.maximum(x @ p["w1"] + p["b1"], 0.0)
    h2 = jnp.maximum(h1 @ p["w2"] + p["b2"], 0.0)
    return h2 @ p["w3"] + p["b3"]


if __name__ == "__main__":
    house_state_dim = 32
    num_classes = 10
    batch = 8

    key = jax.random.PRNGKey(0)
    kx, kp = jax.random.split(key)
    x = jax.random.normal(kx, (batch, house_state_dim), jnp.float32)

    params = init_ar_mlp_params(kp, house_state_dim, num_classes)
    padded = pad_ar_mlp_params(params)        # bf16 weights, f32 biases
    x_bf16 = x.astype(jnp.bfloat16)           # activations stored in bf16 (halves x read)

    fwd = jax.jit(functools.partial(ar_mlp_forward, num_classes=num_classes))
    out = jax.block_until_ready(fwd(x_bf16, padded))

    ref = ar_mlp_reference(x, params)         # f32 reference of the original module
    assert out.shape == (batch, num_classes)
    assert jnp.allclose(out.astype(jnp.float32), ref, atol=5e-2, rtol=5e-2), \
        "mismatch vs f32 reference beyond bf16 tolerance"

    print("KERNEL_OK")
</pallas_src>

<mosaic_0001>
module attributes {stable_mosaic.version = 11 : i64} {
  func.func @_ar_mlp_kernel(%arg0: i32, %arg1: memref<8x32xbf16, #tpu.memory_space<vmem>>, %arg2: memref<32x64xbf16, #tpu.memory_space<vmem>>, %arg3: memref<1x64xf32, #tpu.memory_space<vmem>>, %arg4: memref<64x32xbf16, #tpu.memory_space<vmem>>, %arg5: memref<1x32xf32, #tpu.memory_space<vmem>>, %arg6: memref<32x128xbf16, #tpu.memory_space<vmem>>, %arg7: memref<1x128xf32, #tpu.memory_space<vmem>>, %arg8: memref<8x128xbf16, #tpu.memory_space<vmem>>) attributes {dimension_semantics = [#tpu.dimension_semantics<parallel>], iteration_bounds = array<i64: 1>, scalar_prefetch = 0 : i64, scratch_operands = 0 : i64, tpu.core_type = #tpu.core_type<tc>, window_params = [{transform_indices = @transform_0, window_bounds = array<i64: 8, 32>}, {pipeline_mode = #tpu.pipeline_mode<synchronous>, transform_indices = @transform_1, window_bounds = array<i64: 32, 64>}, {pipeline_mode = #tpu.pipeline_mode<synchronous>, transform_indices = @transform_2, window_bounds = array<i64: 1, 64>}, {pipeline_mode = #tpu.pipeline_mode<synchronous>, transform_indices = @transform_3, window_bounds = array<i64: 64, 32>}, {pipeline_mode = #tpu.pipeline_mode<synchronous>, transform_indices = @transform_4, window_bounds = array<i64: 1, 32>}, {pipeline_mode = #tpu.pipeline_mode<synchronous>, transform_indices = @transform_5, window_bounds = array<i64: 32, 128>}, {pipeline_mode = #tpu.pipeline_mode<synchronous>, transform_indices = @transform_6, window_bounds = array<i64: 1, 128>}, {transform_indices = @transform_7, window_bounds = array<i64: 8, 128>}]} {
    %c0 = arith.constant 0 : index
    %c0_0 = arith.constant 0 : index
    %0 = vector.load %arg1[%c0, %c0_0] : memref<8x32xbf16, #tpu.memory_space<vmem>>, vector<8x32xbf16>
    %c0_1 = arith.constant 0 : index
    %c0_2 = arith.constant 0 : index
    %1 = vector.load %arg2[%c0_1, %c0_2] : memref<32x64xbf16, #tpu.memory_space<vmem>>, vector<32x64xbf16>
    %cst = arith.constant dense<0.000000e+00> : vector<8x64xf32>
    %2 = tpu.matmul %0, %1, %cst {dimension_numbers = #tpu.dot_dimension_numbers<[1], [0], [0], [1], [0, 0, 1, 1], [], []>} : vector<8x32xbf16>, vector<32x64xbf16>, vector<8x64xf32> -> vector<8x64xf32>
    %c0_3 = arith.constant 0 : index
    %c0_4 = arith.constant 0 : index
    %3 = vector.load %arg3[%c0_3, %c0_4] : memref<1x64xf32, #tpu.memory_space<vmem>>, vector<1x64xf32>
    %4 = vector.broadcast %3 : vector<1x64xf32> to vector<8x64xf32>
    %5 = arith.addf %2, %4 : vector<8x64xf32>
    %cst_5 = arith.constant 0.000000e+00 : f32
    %6 = vector.broadcast %cst_5 : f32 to vector<8x64xf32>
    %7 = arith.maximumf %5, %6 : vector<8x64xf32>
    %8 = arith.truncf %7 : vector<8x64xf32> to vector<8x64xbf16>
    %c0_6 = arith.constant 0 : index
    %c0_7 = arith.constant 0 : index
    %9 = vector.load %arg4[%c0_6, %c0_7] : memref<64x32xbf16, #tpu.memory_space<vmem>>, vector<64x32xbf16>
    %cst_8 = arith.constant dense<0.000000e+00> : vector<8x32xf32>
    %10 = tpu.matmul %8, %9, %cst_8 {dimension_numbers = #tpu.dot_dimension_numbers<[1], [0], [0], [1], [0, 0, 1, 1], [], []>} : vector<8x64xbf16>, vector<64x32xbf16>, vector<8x32xf32> -> vector<8x32xf32>
    %c0_9 = arith.constant 0 : index
    %c0_10 = arith.constant 0 : index
    %11 = vector.load %arg5[%c0_9, %c0_10] : memref<1x32xf32, #tpu.memory_space<vmem>>, vector<1x32xf32>
    %12 = vector.broadcast %11 : vector<1x32xf32> to vector<8x32xf32>
    %13 = arith.addf %10, %12 : vector<8x32xf32>
    %cst_11 = arith.constant 0.000000e+00 : f32
    %14 = vector.broadcast %cst_11 : f32 to vector<8x32xf32>
    %15 = arith.maximumf %13, %14 : vector<8x32xf32>
    %16 = arith.truncf %15 : vector<8x32xf32> to vector<8x32xbf16>
    %c0_12 = arith.constant 0 : index
    %c0_13 = arith.constant 0 : index
    %17 = vector.load %arg6[%c0_12, %c0_13] : memref<32x128xbf16, #tpu.memory_space<vmem>>, vector<32x128xbf16>
    %cst_14 = arith.constant dense<0.000000e+00> : vector<8x128xf32>
    %18 = tpu.matmul %16, %17, %cst_14 {dimension_numbers = #tpu.dot_dimension_numbers<[1], [0], [0], [1], [0, 0, 1, 1], [], []>} : vector<8x32xbf16>, vector<32x128xbf16>, vector<8x128xf32> -> vector<8x128xf32>
    %c0_15 = arith.constant 0 : index
    %c0_16 = arith.constant 0 : index
    %19 = vector.load %arg7[%c0_15, %c0_16] : memref<1x128xf32, #tpu.memory_space<vmem>>, vector<1x128xf32>
    %20 = vector.broadcast %19 : vector<1x128xf32> to vector<8x128xf32>
    %21 = arith.addf %18, %20 : vector<8x128xf32>
    %22 = arith.truncf %21 : vector<8x128xf32> to vector<8x128xbf16>
    %c0_17 = arith.constant 0 : index
    %c0_18 = arith.constant 0 : index
    %23 = vector.load %arg8[%c0_17, %c0_18] : memref<8x128xbf16, #tpu.memory_space<vmem>>, vector<8x128xbf16>
    tpu.vector_store %arg8[%c0_17, %c0_18], %22 {strides = array<i32>} : memref<8x128xbf16, #tpu.memory_space<vmem>>, vector<8x128xbf16>,
    return
  }
  func.func @transform_0(%arg0: i32) -> (i32, i32) {
    %c0_i32 = arith.constant 0 : i32
    %c0_i32_0 = arith.constant 0 : i32
    return %arg0, %c0_i32 : i32, i32
  }
  func.func @transform_1(%arg0: i32) -> (i32, i32) {
    %c0_i32 = arith.constant 0 : i32
    %c0_i32_0 = arith.constant 0 : i32
    %c0_i32_1 = arith.constant 0 : i32
    return %c0_i32, %c0_i32_0 : i32, i32
  }
  func.func @transform_2(%arg0: i32) -> (i32, i32) {
    %c0_i32 = arith.constant 0 : i32
    %c0_i32_0 = arith.constant 0 : i32
    %c0_i32_1 = arith.constant 0 : i32
    return %c0_i32, %c0_i32_0 : i32, i32
  }
  func.func @transform_3(%arg0: i32) -> (i32, i32) {
    %c0_i32 = arith.constant 0 : i32
    %c0_i32_0 = arith.constant 0 : i32
    %c0_i32_1 = arith.constant 0 : i32
    return %c0_i32, %c0_i32_0 : i32, i32
  }
  func.func @transform_4(%arg0: i32) -> (i32, i32) {
    %c0_i32 = arith.constant 0 : i32
    %c0_i32_0 = arith.constant 0 : i32
    %c0_i32_1 = arith.constant 0 : i32
    return %c0_i32, %c0_i32_0 : i32, i32
  }
  func.func @transform_5(%arg0: i32) -> (i32, i32) {
    %c0_i32 = arith.constant 0 : i32
    %c0_i32_0 = arith.constant 0 : i32
    %c0_i32_1 = arith.constant 0 : i32
    return %c0_i32, %c0_i32_0 : i32, i32
  }
  func.func @transform_6(%arg0: i32) -> (i32, i32) {
    %c0_i32 = arith.constant 0 : i32
    %c0_i32_0 = arith.constant 0 : i32
    %c0_i32_1 = arith.constant 0 : i32
    return %c0_i32, %c0_i32_0 : i32, i32
  }
  func.func @transform_7(%arg0: i32) -> (i32, i32) {
    %c0_i32 = arith.constant 0 : i32
    %c0_i32_0 = arith.constant 0 : i32
    return %arg0, %c0_i32 : i32, i32
  }
}

</mosaic_0001>

<bundles_post_ra>
// kernel: ar_mlp_forward.1
= control target key start
LH: loop header
LB: loop body
LE: loop exit
PB: predicated region body
PF: predicated region fallthrough
CT: control target
= control target key end

     0   :  { %v351_v1 = vmov 0.0   ;;  %vm352_vm0 = vmmov 0   ;;  %vm52_vm1 = vcmask 261120   ;;  %s438_s0 = inlined_call_operand.vmem [shape: bf16[8,32], index: 0, kind: input, shape index: {}]   ;;  %s439_s1 = inlined_call_operand.vmem [shape: bf16[32,64], index: 1, kind: input, shape index: {}]   ;;  %s440_s2 = inlined_call_operand.vmem [shape: f32[1,64], index: 2, kind: input, shape index: {}]   ;;  %s441_s3 = inlined_call_operand.vmem [shape: bf16[64,32], index: 3, kind: input, shape index: {}]   ;;  %s442_s4 = inlined_call_operand.vmem [shape: f32[1,32], index: 4, kind: input, shape index: {}]   ;;  %s443_s5 = inlined_call_operand.vmem [shape: bf16[32,128], index: 5, kind: input, shape index: {}]   ;;  %s444_s6 = inlined_call_operand.vmem [shape: f32[1,128], index: 6, kind: input, shape index: {}]   ;;  %s445_s7 = inlined_call_operand.hbm [shape: bf16[8,128], index: 7, kind: output, shape index: {}]  }
   0x1   :  { %v321_v0 = vld [vmem:[%s439_s1 + $0x8] sm:$0xff]   ;;  %290 = vmatprep.subr.bf16.mxu0 %v351_v1  ;;  %298 = vmatprep.subr.bf16.mxu1 %v351_v1  ;;  %v322_v2 = vld [vmem:[%s439_s1] sm:$0xff]   ;;  %v323_v3 = vld [vmem:[%s441_s3 + $0x18] sm:$0xff]  }
   0x2   :  { %291 = vmatpush3.bf16.msra.mxu0 %v321_v0  ;;  %294 = vmatprep.mubr.msk.bf16.mxu0 %vm352_vm0, %v351_v1  ;;  %v28_v4 = vld [vmem:[%s438_s0] sm:$0xf]  ;;  %v324_v5 = vld [vmem:[%s441_s3 + $0x10] sm:$0xff]  }
   0x3   :  { %292 = vmatprep.subr.bf16.mxu0 %v351_v1  ;;  %306 = vmatprep.mubr.msk.bf16.mxu1 %vm352_vm0, %v351_v1 }
   0x4   :  { %299 = vmatpush3.bf16.msra.mxu1 %v323_v3 }
   0x5   :  { %300 = vmatprep.subr.bf16.mxu1 %v351_v1 }
   0x6   :  { %293 = vmatpush3.bf16.msra.mxu0 %v322_v2 }
   0x7   :  { %310 = vmatprep.subr.bf16.mxu0 %v351_v1 }
   0x8   :  { %12 = vsyncpa [#allocation3], 0  ;;  %301 = vmatpush3.bf16.msra.mxu1 %v324_v5  ;;  %v325_v6 = vld [vmem:[%s441_s3 + $0x8] sm:$0xff]   ;;  %v326_v7 = vld [vmem:[%s441_s3] sm:$0xff]   ;;  %vm137_vm2 = vcmask 523264  }
   0x9   :  { %295 = vmatmul.mubr.msk.bf16.vlgmr.msra.gmra.mxu0 %vm52_vm1, %v28_v4  ;;  %302 = vmatprep.subr.bf16.mxu1 %v351_v1  ;;  %v327_v8 = vld [vmem:[%s443_s5 + $0x8] sm:$0xff]   ;;  %v265_v9 = vld [vmem:[%s440_s2] ss:$0 sm:$0xff] }
   0xa   :  { %314 = vmatprep.mubr.msk.bf16.mxu0 %vm352_vm0, %v351_v1  ;;  %311 = vmatpush3.bf16.msra.mxu0 %v327_v8  ;;  %v328_v17 = vld [vmem:[%s443_s5] sm:$0xff]   ;;  %s353_s5 = smov [#allocation2]  }
   0xb   :  { %312 = vmatprep.subr.bf16.mxu0 %v351_v1  ;;  %v269_v18 = vld [vmem:[%s442_s4] ss:$0 sm:$0xff]  ;;  %s257_s21 = sshll.u32 %s353_s5, 4  ;;  %s258_s21 = int_to_ptr.vmem [resolvable:$true] %s257_s21 }
   0xc   :  { %303 = vmatpush3.bf16.msra.mxu1 %v325_v6  ;;  %v275_v26 = vld [vmem:[%s444_s6] ss:$0 sm:$0xff]  ;;  %s329_s4 = scalar_lea.vmem %s258_s21, 64  ;;  %p334_p1 = scmp.lt.s32.totalorder %s258_s21, %s258_s21 }
   0xd   :  { %304 = vmatprep.subr.bf16.mxu1 %v351_v1  ;;  %p330_p0 = scmp.ne.s32.totalorder %s258_s21, %s329_s4  ;;  %p335_p2 = scmp.lt.s32.totalorder %s329_s4, %s329_s4 }
   0xe   :  { %313 = vmatpush3.bf16.msra.mxu0 %v328_v17 }
   0xf   :  { %p336_p3 = por %p335_p2, %p334_p1 }
  0x10   :  { %305 = vmatpush3.bf16.msra.mxu1 %v326_v7 }
  0x11   :  { %p337_p4 = pnand %p336_p3, %p330_p0 }
  0xc9   :  { %v90_v10 = vpop.f32.mrf.mxu0 }
  0xca   :  { %v91_v11 = vadd.f32 %v265_v9, %v90_v10 }
  0xcb   :  { %v296_v12 = vpop.f32.mrf.mxu0 }
  0xcc   :  { %v96_v13 = vmax.f32 %v91_v11, 0.0 }
  0xcd   :  { %v93_v14 = vpop.f32.mrf.mxu0 }
  0xce   :  { %v97_v15 = vpack.c.bf16 %v96_v13, %v96_v13 }
  0xcf   :  { %v297_v16 = vpop.f32.mrf.mxu0 }
  0xd0   :  { %307 = vmatmul.mubr.msk.bf16.vlgmr.msra.gmra.mxu1 %vm137_vm2, %v97_v15 }
 0x190   :  { %v175_v19 = vpop.f32.mrf.mxu1 }
 0x191   :  { %v176_v20 = vadd.f32 %v269_v18, %v175_v19 }
 0x192   :  { %v308_v21 = vpop.f32.mrf.mxu1 }
 0x193   :  { %v181_v22 = vmax.f32 %v176_v20, 0.0 }
 0x194   :  { %v178_v23 = vpop.f32.mrf.mxu1 }
 0x195   :  { %v182_v24 = vpack.c.bf16 %v181_v22, %v181_v22 }
 0x196   :  { %v309_v25 = vpop.f32.mrf.mxu1 }
 0x197   :  { %315 = vmatmul.mubr.msk.bf16.vlgmr.msra.gmra.mxu0 %vm52_vm1, %v182_v24 }
 0x257   :  { %v243_v27 = vpop.f32.mrf.mxu0 }
 0x258   :  { %v244_v28 = vadd.f32 %v275_v26, %v243_v27 }
 0x259   :  { %v316_v29 = vpop.f32.mrf.mxu0 }
 0x25a   :  { %v249_v30 = vpack.c.bf16 %v244_v28, %v244_v28 }
 0x25b   :  { %v246_v31 = vpop.f32.mrf.mxu0 }
 0x25c   :  { %250 = vst [vmem:[#allocation2] sm:$0xf] %v249_v30 }
 0x25d   :  { %v317_v32 = vpop.f32.mrf.mxu0 }
 0x25e   :  { %340 = shalt.err (!%p337_p4)
}
 0x25f   :  { %260 = dma.vmem_to_hbm [thread:$0]  %s258_s21, 64, %s445_s7, [#allocation3]  }
 0x260   :  { %349 = dma.done.wait [#allocation3], 64  }
 0x261   :  { %350 = vsyncadd [#allocation3], 4294967232 }
 0x262   :  { %264 = vsyncpa [#allocation3], 1 }

</bundles_post_ra>
